<compile_context>
chip_gen: v7x
topology: tpu7x:2x2x1
jax: 0.10.0
libtpu: 0.0.40
codegen_flags: <defaults>
</compile_context>

<pallas_src>
import math
import functools

import jax
import jax.numpy as jnp
from jax.experimental import pallas as pl
from jax.experimental.pallas import tpu as pltpu

EPS = 1e-6
NEG_INF = -1e9

# MXU operand dtype (accumulation is always f32 via preferred_element_type).
MATMUL_DTYPE = jnp.bfloat16
# Raise v5e's 16 MiB scoped-VMEM default; within v6e/v7x budgets.
VMEM_LIMIT = 32 * 1024 * 1024


# ------------------------------ tile picking --------------------------------

def _pick_m_tile(m, preferred=(512, 256, 128, 64, 32, 16, 8)):
    """Largest sublane-aligned tile that evenly divides m."""
    for t in preferred:
        if t <= m and m % t == 0:
            return t
    # TODO(synk): pad/mask the last row tile for awkward (non multiple-of-8) M.
    return m


def _pick_n_tile(n, k_rows, itemsize, budget=4 << 20):
    """Largest lane-aligned (multiple of 128) tile dividing n whose full-K,
    double-buffered weight block stays under `budget`; otherwise the full
    width (always layout-legal)."""
    for t in (512, 256, 128):
        if t <= n and n % t == 0 and 2 * k_rows * t * itemsize <= budget:
            return t
    return n


def _cparams(sem):
    return pltpu.CompilerParams(dimension_semantics=sem,
                                vmem_limit_bytes=VMEM_LIMIT)


# ----------------------------- Pallas kernels -------------------------------

def _ln_linear_kernel(x_ref, g_ref, b_ref, w_ref, wb_ref, o_ref, xn_ref, *, act):
    """Fused LayerNorm (torch-style unbiased std, eps on std) + matmul (+GELU).

    The normalized row block is computed once (at j == 0) into VMEM scratch in
    MATMUL_DTYPE and reused for every N tile; the j axis is 'arbitrary'."""
    @pl.when(pl.program_id(1) == 0)
    def _():
        x = x_ref[...].astype(jnp.float32)
        mean = jnp.mean(x, axis=-1, keepdims=True)
        var = jnp.sum((x - mean) ** 2, axis=-1, keepdims=True) / (x.shape[-1] - 1)
        inv = pl.reciprocal(jnp.sqrt(var) + EPS, approx=False)        # [tm, 1]
        xn = g_ref[...] * ((x - mean) * inv) + b_ref[...]
        xn_ref[...] = xn.astype(xn_ref.dtype)

    y = jnp.dot(xn_ref[...], w_ref[...].astype(MATMUL_DTYPE),
                preferred_element_type=jnp.float32) + wb_ref[...]
    if act == "gelu":
        # exact (erf) GELU in f32 (matches torch.nn.GELU() default)
        y = 0.5 * y * (1.0 + jax.lax.erf(y * (1.0 / math.sqrt(2.0))))
    o_ref[...] = y.astype(o_ref.dtype)


def _linear_residual_kernel(x_ref, w_ref, wb_ref, r_ref, *rest, final_ln):
    """Fused matmul + bias + residual add; optionally fuses the Encoder's
    final LayerNorm into the epilogue (requires a full-width N tile)."""
    if final_ln:
        g_ref, b_ref, o_ref = rest
    else:
        (o_ref,) = rest
    y = (jnp.dot(x_ref[...].astype(MATMUL_DTYPE), w_ref[...].astype(MATMUL_DTYPE),
                 preferred_element_type=jnp.float32)
         + wb_ref[...] + r_ref[...].astype(jnp.float32))
    if final_ln:
        mean = jnp.mean(y, axis=-1, keepdims=True)
        var = jnp.sum((y - mean) ** 2, axis=-1, keepdims=True) / (y.shape[-1] - 1)
        inv = pl.reciprocal(jnp.sqrt(var) + EPS, approx=False)
        y = g_ref[...] * ((y - mean) * inv) + b_ref[...]
    o_ref[...] = y.astype(o_ref.dtype)


def _layernorm_kernel(x_ref, g_ref, b_ref, o_ref):
    x = x_ref[...].astype(jnp.float32)
    mean = jnp.mean(x, axis=-1, keepdims=True)
    var = jnp.sum((x - mean) ** 2, axis=-1, keepdims=True) / (x.shape[-1] - 1)
    inv = pl.reciprocal(jnp.sqrt(var) + EPS, approx=False)
    o_ref[...] = (g_ref[...] * ((x - mean) * inv) + b_ref[...]).astype(o_ref.dtype)


def _attention_kernel(qkv_ref, bias_ref, o_ref, *, scale):
    """One (batch, head) step: per-head dk-length contractions (no redundant
    MXU work), f32 softmax, additive key-padding bias broadcast per row."""
    q = qkv_ref[0].astype(MATMUL_DTYPE)                 # [Sq, dk]
    k = qkv_ref[1].astype(MATMUL_DTYPE)                 # [Sk, dk]
    v = qkv_ref[2].astype(MATMUL_DTYPE)                 # [Sk, dk]
    s = jax.lax.dot_general(q, k, (((1,), (1,)), ((), ())),
                            preferred_element_type=jnp.float32)
    s = s * scale + bias_ref[...].astype(jnp.float32)   # [Sq, Sk]
    mx = jnp.max(s, axis=-1, keepdims=True)
    e = jnp.exp(s - mx)
    p = e * pl.reciprocal(jnp.sum(e, axis=-1, keepdims=True), approx=False)
    o = jnp.dot(p.astype(MATMUL_DTYPE), v, preferred_element_type=jnp.float32)
    o_ref[...] = o.astype(o_ref.dtype)


# -------------------------------- wrappers ----------------------------------

def ln_linear(x2d, g, b, w, wb, act=None, out_dtype=None):
    m, d = x2d.shape
    n = w.shape[1]
    tm = _pick_m_tile(m)
    tn = _pick_n_tile(n, d, w.dtype.itemsize)
    out_dtype = out_dtype or x2d.dtype
    return pl.pallas_call(
        functools.partial(_ln_linear_kernel, act=act),
        out_shape=jax.ShapeDtypeStruct((m, n), out_dtype),
        grid=(m // tm, n // tn),
        in_specs=[pl.BlockSpec((tm, d), lambda i, j: (i, 0)),
                  pl.BlockSpec((1, d), lambda i, j: (0, 0)),
                  pl.BlockSpec((1, d), lambda i, j: (0, 0)),
                  pl.BlockSpec((d, tn), lambda i, j: (0, j)),
                  pl.BlockSpec((1, tn), lambda i, j: (0, j))],
        out_specs=pl.BlockSpec((tm, tn), lambda i, j: (i, j)),
        scratch_shapes=[pltpu.VMEM((tm, d), MATMUL_DTYPE)],
        # j axis MUST be 'arbitrary': the scratch-held normalized tile is
        # written at j == 0 and reused by the later j steps of the same i.
        compiler_params=_cparams(("parallel", "arbitrary")),
    )(x2d, g.reshape(1, d), b.reshape(1, d), w, wb.reshape(1, n))


def linear_residual(x2d, w, wb, res2d, final_ln=None):
    m, k = x2d.shape
    n = w.shape[1]
    tm = _pick_m_tile(m)
    tn = _pick_n_tile(n, k, w.dtype.itemsize)
    fuse_ln = final_ln is not None and tn == n
    in_specs = [pl.BlockSpec((tm, k), lambda i, j: (i, 0)),
                pl.BlockSpec((k, tn), lambda i, j: (0, j)),
                pl.BlockSpec((1, tn), lambda i, j: (0, j)),
                pl.BlockSpec((tm, tn), lambda i, j: (i, j))]
    args = [x2d, w, wb.reshape(1, n), res2d]
    if fuse_ln:
        g, b = final_ln
        in_specs += [pl.BlockSpec((1, n), lambda i, j: (0, 0)),
                     pl.BlockSpec((1, n), lambda i, j: (0, 0))]
        args += [g.reshape(1, n), b.reshape(1, n)]
    out = pl.pallas_call(
        functools.partial(_linear_residual_kernel, final_ln=fuse_ln),
        out_shape=jax.ShapeDtypeStruct((m, n), res2d.dtype),
        grid=(m // tm, n // tn),
        in_specs=in_specs,
        out_specs=pl.BlockSpec((tm, tn), lambda i, j: (i, j)),
        compiler_params=_cparams(("parallel", "parallel")),
    )(*args)
    if final_ln is not None and not fuse_ln:
        out = layernorm(out, *final_ln)       # fallback when N is tiled
    return out


def layernorm(x2d, g, b):
    m, d = x2d.shape
    tm = _pick_m_tile(m)
    return pl.pallas_call(
        _layernorm_kernel,
        out_shape=jax.ShapeDtypeStruct((m, d), x2d.dtype),
        grid=(m // tm,),
        in_specs=[pl.BlockSpec((tm, d), lambda i: (i, 0)),
                  pl.BlockSpec((1, d), lambda i: (0, 0)),
                  pl.BlockSpec((1, d), lambda i: (0, 0))],
        out_specs=pl.BlockSpec((tm, d), lambda i: (i, 0)),
        compiler_params=_cparams(("parallel",)),
    )(x2d, g.reshape(1, d), b.reshape(1, d))


def attention(qkv_h, bias, num_heads, dk):
    """qkv_h: [B*H, 3, S, dk]; bias: [B, bq, S] additive mask bias, bq in {1,S}."""
    BH, _, S, _ = qkv_h.shape
    B = BH // num_heads
    H = num_heads
    bq = bias.shape[1]
    scale = 1.0 / math.sqrt(dk)
    return pl.pallas_call(
        functools.partial(_attention_kernel, scale=scale),
        out_shape=jax.ShapeDtypeStruct((BH, S, dk), qkv_h.dtype),
        grid=(B, H),
        in_specs=[pl.BlockSpec((None, 3, S, dk), lambda b, h: (b * H + h, 0, 0, 0)),
                  pl.BlockSpec((None, bq, S), lambda b, h: (b, 0, 0))],
        out_specs=pl.BlockSpec((None, S, dk), lambda b, h: (b * H + h, 0, 0)),
        # TODO(synk): flash-style online-softmax Sq/Sk tiling for long S.
        compiler_params=_cparams(("parallel", "parallel")),
    )(qkv_h, bias)


# ------------------------------ encoder forward ------------------------------

def encoder_forward(params, num_heads, x, mask):
    """x: [B, S, D]; mask broadcastable to [B, 1, q, S] with q in {1, S}
    (positions where mask == 0 are hidden, PyTorch masked_fill convention)."""
    B, S, D = x.shape
    H = num_heads
    dk = D // H
    M = B * S
    x2d = x.reshape(M, D)

    # Additive attention bias.  For the usual encoder padding mask the query
    # dim is 1, so this stays a rank-1 [B, 1, S] row (no [B, S, S] slab).
    mask4 = jnp.broadcast_to(mask, (B, 1, mask.shape[-2], S))
    bias = jnp.where(mask4[:, 0] == 0, NEG_INF, 0.0).astype(jnp.float32)

    n_layers = len(params["layers"])
    for li, lp in enumerate(params["layers"]):
        is_last = li == n_layers - 1
        # --- self-attention residual block (pre-norm) ---
        qkv = ln_linear(x2d, lp["ln0_g"], lp["ln0_b"], lp["w_qkv"], lp["b_qkv"],
                        out_dtype=MATMUL_DTYPE)
        # [M, 3D] -> [B*H, 3, S, dk]: one bf16 transpose; gives per-head
        # dk-length contractions inside the attention kernel.
        qkv_h = (qkv.reshape(B, S, 3, H, dk)
                    .transpose(0, 3, 2, 1, 4)
                    .reshape(B * H, 3, S, dk))
        ctx = attention(qkv_h, bias, H, dk)                      # [B*H, S, dk]
        ctx2d = ctx.reshape(B, H, S, dk).transpose(0, 2, 1, 3).reshape(M, D)
        x2d = linear_residual(ctx2d, lp["wo"], lp["bo"], x2d)
        # --- feed-forward residual block (pre-norm) ---
        hid = ln_linear(x2d, lp["ln1_g"], lp["ln1_b"], lp["w1"], lp["b1"],
                        act="gelu", out_dtype=MATMUL_DTYPE)
        x2d = linear_residual(hid, lp["w2"], lp["b2"], x2d,
                              final_ln=((params["norm_g"], params["norm_b"])
                                        if is_last else None))
    return x2d.reshape(B, S, D)


# --------------------------- pure-JAX reference -------------------------------

def _ref_layernorm(x, g, b):
    mean = x.mean(-1, keepdims=True)
    var = ((x - mean) ** 2).sum(-1, keepdims=True) / (x.shape[-1] - 1)
    return g * (x - mean) / (jnp.sqrt(var) + EPS) + b


def _ref_gelu(x):
    return 0.5 * x * (1.0 + jax.lax.erf(x / math.sqrt(2.0)))


def _ref_mha(wqkv, bqkv, wo, bo, h, x, mask):
    B, S, Dm = x.shape
    dk = Dm // h
    qkv = x @ wqkv.astype(jnp.float32) + bqkv
    q = qkv[..., :Dm].reshape(B, S, h, dk).transpose(0, 2, 1, 3)
    k = qkv[..., Dm:2 * Dm].reshape(B, S, h, dk).transpose(0, 2, 1, 3)
    v = qkv[..., 2 * Dm:].reshape(B, S, h, dk).transpose(0, 2, 1, 3)
    s = jnp.einsum("bhqd,bhkd->bhqk", q, k) / math.sqrt(dk)
    s = jnp.where(mask == 0, NEG_INF, s)
    a = jax.nn.softmax(s, axis=-1)
    o = jnp.einsum("bhqk,bhkd->bhqd", a, v).transpose(0, 2, 1, 3).reshape(B, S, Dm)
    return o @ wo.astype(jnp.float32) + bo


def ref_encoder(params, h, x, mask):
    for lp in params["layers"]:
        n = _ref_layernorm(x, lp["ln0_g"], lp["ln0_b"])
        x = x + _ref_mha(lp["w_qkv"], lp["b_qkv"], lp["wo"], lp["bo"], h, n, mask)
        n = _ref_layernorm(x, lp["ln1_g"], lp["ln1_b"])
        x = x + (_ref_gelu(n @ lp["w1"].astype(jnp.float32) + lp["b1"])
                 @ lp["w2"].astype(jnp.float32) + lp["b2"])
    return _ref_layernorm(x, params["norm_g"], params["norm_b"])


# --------------------------------- params ------------------------------------

def init_params(key, n_layers, d_model, d_ff):
    keys = iter(jax.random.split(key, 8 * n_layers + 1))

    def w(shape):
        # Weight matrices stored in bf16: halves weight HBM/VMEM bytes; both
        # the kernel and the f32 reference use exactly these (upcast) values.
        return (jax.random.normal(next(keys), shape, jnp.float32) * 0.02
                ).astype(jnp.bfloat16)

    def bias(shape):
        return jax.random.normal(next(keys), shape, jnp.float32) * 0.02

    layers = []
    for _ in range(n_layers):
        layers.append({
            "ln0_g": jnp.ones((d_model,), jnp.float32),
            "ln0_b": jnp.zeros((d_model,), jnp.float32),
            "w_qkv": w((d_model, 3 * d_model)), "b_qkv": bias((3 * d_model,)),
            "wo": w((d_model, d_model)), "bo": bias((d_model,)),
            "ln1_g": jnp.ones((d_model,), jnp.float32),
            "ln1_b": jnp.zeros((d_model,), jnp.float32),
            "w1": w((d_model, d_ff)), "b1": bias((d_ff,)),
            "w2": w((d_ff, d_model)), "b2": bias((d_model,)),
        })
    return {"layers": layers,
            "norm_g": jnp.ones((d_model,), jnp.float32),
            "norm_b": jnp.zeros((d_model,), jnp.float32)}


# ----------------------------------- main -------------------------------------

if __name__ == "__main__":
    B, S, D, H, D_FF, N_LAYERS = 2, 8, 32, 4, 128, 2

    key = jax.random.PRNGKey(0)
    k_p, k_x = jax.random.split(key)
    params = init_params(k_p, N_LAYERS, D, D_FF)
    x = jax.random.normal(k_x, (B, S, D), jnp.float32)

    # encoder padding mask (PyTorch convention: positions where mask == 0 are
    # hidden): batch 0 is full length, batch 1 has its last 2 positions padded.
    lengths = jnp.array([S, S - 2])
    mask = (jnp.arange(S)[None, :] < lengths[:, None]).astype(jnp.float32)
    mask = mask[:, None, None, :]                       # [B, 1, 1, S]

    out = encoder_forward(params, H, x, mask)
    out = jax.block_until_ready(out)

    ref = ref_encoder(params, H, x, mask)
    assert out.shape == x.shape
    err = float(jnp.max(jnp.abs(out - ref)))
    # tolerance covers bf16 MXU operands (accumulation / LN / softmax stay f32)
    assert jnp.allclose(out, ref, rtol=2e-2, atol=2e-2), f"max abs err {err}"
    print("KERNEL_OK")
</pallas_src>

<mosaic_0001>
module attributes {stable_mosaic.version = 11 : i64} {
  func.func @_ln_linear_kernel(%arg0: i32, %arg1: i32, %arg2: memref<16x32xf32, #tpu.memory_space<vmem>>, %arg3: memref<1x32xf32, #tpu.memory_space<vmem>>, %arg4: memref<1x32xf32, #tpu.memory_space<vmem>>, %arg5: memref<32x96xbf16, #tpu.memory_space<vmem>>, %arg6: memref<1x96xf32, #tpu.memory_space<vmem>>, %arg7: memref<16x96xbf16, #tpu.memory_space<vmem>>, %arg8: memref<16x32xbf16, #tpu.memory_space<vmem>>) attributes {dimension_semantics = [#tpu.dimension_semantics<parallel>, #tpu.dimension_semantics<arbitrary>], iteration_bounds = array<i64: 1, 1>, scalar_prefetch = 0 : i64, scratch_operands = 1 : i64, tpu.core_type = #tpu.core_type<tc>, window_params = [{transform_indices = @transform_0, window_bounds = array<i64: 16, 32>}, {pipeline_mode = #tpu.pipeline_mode<synchronous>, transform_indices = @transform_1, window_bounds = array<i64: 1, 32>}, {pipeline_mode = #tpu.pipeline_mode<synchronous>, transform_indices = @transform_2, window_bounds = array<i64: 1, 32>}, {transform_indices = @transform_3, window_bounds = array<i64: 32, 96>}, {transform_indices = @transform_4, window_bounds = array<i64: 1, 96>}, {transform_indices = @transform_5, window_bounds = array<i64: 16, 96>}]} {
    %c0_i32 = arith.constant 0 : i32
    %0 = arith.cmpi eq, %arg1, %c0_i32 : i32
    %1 = arith.extui %0 : i1 to i32
    %c0_i32_0 = arith.constant 0 : i32
    %2 = arith.cmpi ne, %1, %c0_i32_0 : i32
    scf.if %2 {
      %c0_8 = arith.constant 0 : index
      %c0_9 = arith.constant 0 : index
      %11 = vector.load %arg2[%c0_8, %c0_9] : memref<16x32xf32, #tpu.memory_space<vmem>>, vector<16x32xf32>
      %cst_10 = arith.constant dense<0.000000e+00> : vector<16xf32>
      %12 = vector.multi_reduction <add>, %11, %cst_10 [1] : vector<16x32xf32> to vector<16xf32>
      %13 = vector.shape_cast %12 : vector<16xf32> to vector<16x1xf32>
      %cst_11 = arith.constant 3.200000e+01 : f32
      %14 = vector.broadcast %cst_11 : f32 to vector<16x1xf32>
      %15 = arith.divf %13, %14 : vector<16x1xf32>
      %16 = vector.broadcast %15 : vector<16x1xf32> to vector<16x32xf32>
      %17 = arith.subf %11, %16 : vector<16x32xf32>
      %18 = arith.mulf %17, %17 : vector<16x32xf32>
      %cst_12 = arith.constant dense<0.000000e+00> : vector<16xf32>
      %19 = vector.multi_reduction <add>, %18, %cst_12 [1] : vector<16x32xf32> to vector<16xf32>
      %20 = vector.shape_cast %19 : vector<16xf32> to vector<16x1xf32>
      %cst_13 = arith.constant 3.100000e+01 : f32
      %21 = vector.broadcast %cst_13 : f32 to vector<16x1xf32>
      %22 = arith.divf %20, %21 : vector<16x1xf32>
      %23 = math.sqrt %22 : vector<16x1xf32>
      %cst_14 = arith.constant 9.99999997E-7 : f32
      %24 = vector.broadcast %cst_14 : f32 to vector<16x1xf32>
      %25 = arith.addf %23, %24 : vector<16x1xf32>
      %26 = tpu.reciprocal %25 : vector<16x1xf32> -> vector<16x1xf32>
      %c0_15 = arith.constant 0 : index
      %c0_16 = arith.constant 0 : index
      %27 = vector.load %arg3[%c0_15, %c0_16] : memref<1x32xf32, #tpu.memory_space<vmem>>, vector<1x32xf32>
      %28 = vector.broadcast %15 : vector<16x1xf32> to vector<16x32xf32>
      %29 = arith.subf %11, %28 : vector<16x32xf32>
      %30 = vector.broadcast %26 : vector<16x1xf32> to vector<16x32xf32>
      %31 = arith.mulf %29, %30 : vector<16x32xf32>
      %32 = vector.broadcast %27 : vector<1x32xf32> to vector<16x32xf32>
      %33 = arith.mulf %32, %31 : vector<16x32xf32>
      %c0_17 = arith.constant 0 : index
      %c0_18 = arith.constant 0 : index
      %34 = vector.load %arg4[%c0_17, %c0_18] : memref<1x32xf32, #tpu.memory_space<vmem>>, vector<1x32xf32>
      %35 = vector.broadcast %34 : vector<1x32xf32> to vector<16x32xf32>
      %36 = arith.addf %33, %35 : vector<16x32xf32>
      %37 = arith.truncf %36 : vector<16x32xf32> to vector<16x32xbf16>
      %c0_19 = arith.constant 0 : index
      %c0_20 = arith.constant 0 : index
      %38 = vector.load %arg8[%c0_19, %c0_20] : memref<16x32xbf16, #tpu.memory_space<vmem>>, vector<16x32xbf16>
      tpu.vector_store %arg8[%c0_19, %c0_20], %37 {strides = array<i32>} : memref<16x32xbf16, #tpu.memory_space<vmem>>, vector<16x32xbf16>,
    } else {
    }
    %c0 = arith.constant 0 : index
    %c0_1 = arith.constant 0 : index
    %3 = vector.load %arg8[%c0, %c0_1] : memref<16x32xbf16, #tpu.memory_space<vmem>>, vector<16x32xbf16>
    %c0_2 = arith.constant 0 : index
    %c0_3 = arith.constant 0 : index
    %4 = vector.load %arg5[%c0_2, %c0_3] : memref<32x96xbf16, #tpu.memory_space<vmem>>, vector<32x96xbf16>
    %cst = arith.constant dense<0.000000e+00> : vector<16x96xf32>
    %5 = tpu.matmul %3, %4, %cst {dimension_numbers = #tpu.dot_dimension_numbers<[1], [0], [0], [1], [0, 0, 1, 1], [], []>} : vector<16x32xbf16>, vector<32x96xbf16>, vector<16x96xf32> -> vector<16x96xf32>
    %c0_4 = arith.constant 0 : index
    %c0_5 = arith.constant 0 : index
    %6 = vector.load %arg6[%c0_4, %c0_5] : memref<1x96xf32, #tpu.memory_space<vmem>>, vector<1x96xf32>
    %7 = vector.broadcast %6 : vector<1x96xf32> to vector<16x96xf32>
    %8 = arith.addf %5, %7 : vector<16x96xf32>
    %9 = arith.truncf %8 : vector<16x96xf32> to vector<16x96xbf16>
    %c0_6 = arith.constant 0 : index
    %c0_7 = arith.constant 0 : index
    %10 = vector.load %arg7[%c0_6, %c0_7] : memref<16x96xbf16, #tpu.memory_space<vmem>>, vector<16x96xbf16>
    tpu.vector_store %arg7[%c0_6, %c0_7], %9 {strides = array<i32>} : memref<16x96xbf16, #tpu.memory_space<vmem>>, vector<16x96xbf16>,
    return
  }
  func.func @transform_0(%arg0: i32, %arg1: i32) -> (i32, i32) {
    %c0_i32 = arith.constant 0 : i32
    %c0_i32_0 = arith.constant 0 : i32
    return %arg0, %c0_i32 : i32, i32
  }
  func.func @transform_1(%arg0: i32, %arg1: i32) -> (i32, i32) {
    %c0_i32 = arith.constant 0 : i32
    %c0_i32_0 = arith.constant 0 : i32
    %c0_i32_1 = arith.constant 0 : i32
    return %c0_i32, %c0_i32_0 : i32, i32
  }
  func.func @transform_2(%arg0: i32, %arg1: i32) -> (i32, i32) {
    %c0_i32 = arith.constant 0 : i32
    %c0_i32_0 = arith.constant 0 : i32
    %c0_i32_1 = arith.constant 0 : i32
    return %c0_i32, %c0_i32_0 : i32, i32
  }
  func.func @transform_3(%arg0: i32, %arg1: i32) -> (i32, i32) {
    %c0_i32 = arith.constant 0 : i32
    %c0_i32_0 = arith.constant 0 : i32
    return %c0_i32, %arg1 : i32, i32
  }
  func.func @transform_4(%arg0: i32, %arg1: i32) -> (i32, i32) {
    %c0_i32 = arith.constant 0 : i32
    %c0_i32_0 = arith.constant 0 : i32
    return %c0_i32, %arg1 : i32, i32
  }
  func.func @transform_5(%arg0: i32, %arg1: i32) -> (i32, i32) {
    %c0_i32 = arith.constant 0 : i32
    return %arg0, %arg1 : i32, i32
  }
}

</mosaic_0001>

<bundles_post_ra>
// kernel: tpu_custom_call.1
= control target key start
LH: loop header
LB: loop body
LE: loop exit
PB: predicated region body
PF: predicated region fallthrough
CT: control target
= control target key end

     0   :  { %10 = vsyncpa [#allocation4], 0  ;;  %s425_s0 = inlined_call_operand.hbm [shape: f32[16,32], index: 0, kind: input, shape index: {}]   ;;  %s426_s1 = inlined_call_operand.vmem [shape: f32[1,32], index: 1, kind: input, shape index: {}]   ;;  %s427_s2 = inlined_call_operand.vmem [shape: f32[1,32], index: 2, kind: input, shape index: {}]   ;;  %s428_s3 = inlined_call_operand.hbm [shape: bf16[32,96], index: 3, kind: input, shape index: {}]   ;;  %s429_s4 = inlined_call_operand.vmem [shape: f32[1,96], index: 4, kind: input, shape index: {}]   ;;  %s430_s5 = inlined_call_operand.hbm [shape: bf16[16,96], index: 5, kind: output, shape index: {}]  }
   0x1   :  { %11 = vsyncpa [#allocation7], 0 }
   0x2   :  { %12 = vsyncpa [#allocation5], 0  ;;  %s329_s18 = smov [#allocation3]   ;;  %s257_s22 = scalar_lea.hbm %s425_s0, 256 }
   0x3   :  { %s18_s19 = sshll.u32 %s329_s18, 4  ;;  %p258_p0 = scmp.ne.s32.totalorder %s425_s0, %s257_s22  ;;  %s19_s19 = int_to_ptr.vmem [resolvable:$true] %s18_s19 }
   0x4   :  { %p261_p1 = scmp.lt.u32.totalorder %s257_s22, %s425_s0 }
   0x6   :  { %p263_p2 = pnand %p261_p1, %p258_p0 }
   0x8   :  { %266 = shalt.err (!%p263_p2)
}
   0x9   :  { %s267_s27 = scalar_lea.vmem %s19_s19, 256  ;;  %p272_p4 = scmp.lt.s32.totalorder %s19_s19, %s19_s19 }
   0xa   :  { %p268_p3 = scmp.ne.s32.totalorder %s19_s19, %s267_s27  ;;  %p273_p5 = scmp.lt.s32.totalorder %s267_s27, %s267_s27 }
   0xc   :  { %p274_p6 = por %p273_p5, %p272_p4 }
   0xe   :  { %p275_p7 = pnand %p274_p6, %p268_p3 }
  0x10   :  { %278 = shalt.err (!%p275_p7)
}
  0x11   :  { %s330_s28 = smov 128   ;;  %s331_s29 = smov 8  }
  0x12   :  { %24 = dma.hbm_to_vmem [thread:$0]  %s425_s0, 256, %s19_s19, [#allocation4], %s330_s28, %s330_s28, %s331_s29  }
  0x13   :  { %s332_s7 = smov [#allocation6]   ;;  %s279_s11 = scalar_lea.hbm %s428_s3, 256 }
  0x14   :  { %s34_s8 = sshll.u32 %s332_s7, 4  ;;  %p280_p8 = scmp.ne.s32.totalorder %s428_s3, %s279_s11  ;;  %s35_s8 = int_to_ptr.vmem [resolvable:$true] %s34_s8 }
  0x15   :  { %p283_p9 = scmp.lt.u32.totalorder %s279_s11, %s428_s3 }
  0x17   :  { %p285_p10 = pnand %p283_p9, %p280_p8 }
  0x19   :  { %288 = shalt.err (!%p285_p10)
}
  0x1a   :  { %s289_s16 = scalar_lea.vmem %s35_s8, 256  ;;  %p294_p12 = scmp.lt.s32.totalorder %s35_s8, %s35_s8 }
  0x1b   :  { %p290_p11 = scmp.ne.s32.totalorder %s35_s8, %s289_s16  ;;  %p295_p13 = scmp.lt.s32.totalorder %s289_s16, %s289_s16 }
  0x1d   :  { %p296_p0 = por %p295_p13, %p294_p12 }
  0x1f   :  { %p297_p1 = pnand %p296_p0, %p290_p11 }
  0x21   :  { %300 = shalt.err (!%p297_p1)
}
  0x22   :  { %s333_s0 = smov 64   ;;  %s334_s17 = smov 4  }
  0x23   :  { %40 = dma.hbm_to_vmem [thread:$0]  %s428_s3, 256, %s35_s8, [#allocation7], %s333_s0, %s333_s0, %s334_s17  }
  0x24   :  { %323 = dma.done.wait [#allocation4], 256  }
  0x25   :  { %324 = vsyncadd [#allocation4], 4294967040 }
  0x26   :  { %325 = dma.done.wait [#allocation7], 256  }
  0x27   :  { %326 = vsyncadd [#allocation7], 4294967040  ;;  %vm56_vm0 = vcmask 261120   ;;  %v54_v0 = vld [vmem:[#allocation3] sm:$0xff]  ;;  %v55_v1 = vld [vmem:[#allocation3 + $0x8] sm:$0xff]  ;;  %v335_v15 = vmov 0.0  }
  0x28   :  { %v57_v2 = vsel %vm56_vm0, %v54_v0, 0.0  ;;  %v60_v3 = vsel %vm56_vm0, %v55_v1, 0.0  ;;  %v247_v14 = vld [vmem:[#allocation6] sm:$0xff]   ;;  %230 = vmatprep.subr.bf16.mxu0 %v335_v15  ;;  %v248_v16 = vld [vmem:[#allocation6 + $0x8] sm:$0xff]   ;;  %vm336_vm1 = vmmov 0   ;;  %vm196_vm6 = vcmask 781312  }
  0x29   :  { %58 = vadd.xlane.f32.xlu0 %v57_v2  ;;  %231 = vmatpush3.bf16.msra.mxu0 %v247_v14  ;;  %v217_v35 = vld [vmem:[%s426_s1] ss:$0 sm:$0xff]  ;;  %s337_s1 = smov [#allocation8]  }
  0x2a   :  { %234 = vmatprep.mubr.msk.bf16.mxu0 %vm336_vm1, %v335_v15  ;;  %232 = vmatprep.subr.bf16.mxu0 %v335_v15  ;;  %v218_v39 = vld [vmem:[%s427_s2] ss:$0 sm:$0xff]  ;;  %s204_s2 = sshll.u32 %s337_s1, 4  ;;  %s205_s2 = int_to_ptr.vmem [resolvable:$true] %s204_s2 }
  0x2b   :  { %v219_v45 = vld [vmem:[%s429_s4] ss:$0 sm:$0xff]  ;;  %s301_s25 = scalar_lea.vmem %s205_s2, 128  ;;  %p306_p3 = scmp.lt.s32.totalorder %s205_s2, %s205_s2 }
  0x2c   :  { %p302_p2 = scmp.ne.s32.totalorder %s205_s2, %s301_s25  ;;  %p307_p4 = scmp.lt.s32.totalorder %s301_s25, %s301_s25 }
  0x2d   :  { %61 = vadd.xlane.f32.xlu0 %v60_v3  ;;  %233 = vmatpush3.bf16.msra.mxu0 %v248_v16 }
  0x2e   :  { %p308_p5 = por %p307_p4, %p306_p3 }
  0x30   :  { %p309_p6 = pnand %p308_p5, %p302_p2 }
  0xb6   :  { %v59_v4 = vpop.xlane.xlu0 %58 }
  0xb7   :  { %v64_v5 = vmul.f32 0.03125, %v59_v4 }
  0xb9   :  { %v66_v6 = vsub.f32 %v54_v0, %v64_v5 }
  0xba   :  { %v62_v7 = vpop.xlane.xlu0 %61 }
  0xbb   :  { %v65_v8 = vmul.f32 0.03125, %v62_v7  ;;  %v68_v9 = vmul.f32 %v66_v6, %v66_v6 }
  0xbd   :  { %v67_v10 = vsub.f32 %v55_v1, %v65_v8  ;;  %v70_v11 = vsel %vm56_vm0, %v68_v9, 0.0 }
  0xbe   :  { %71 = vadd.xlane.f32.xlu1 %v70_v11 }
  0xbf   :  { %v69_v12 = vmul.f32 %v67_v10, %v67_v10 }
  0xc1   :  { %v73_v13 = vsel %vm56_vm0, %v69_v12, 0.0 }
  0xc2   :  { %74 = vadd.xlane.f32.xlu1 %v73_v13 }
 0x14b   :  { %v72_v17 = vpop.xlane.xlu1 %71 }
 0x14c   :  { %v77_v18 = vmul.f32 0.032258064, %v72_v17 }
 0x14e   :  { %249 = vrsqrt.f32 %v77_v18  ;;  %vm81_vm2 = vcmp.eq.f32.partialorder %v77_v18, inf  ;;  %v84_v23 = vand.u32 2147483648, %v77_v18  ;;  %vm83_vm3 = vcmp.eq.f32.partialorder %v77_v18, 0.0 }
 0x14f   :  { %v75_v19 = vpop.xlane.xlu1 %74 }
 0x150   :  { %v78_v20 = vmul.f32 0.032258064, %v75_v19 }
 0x152   :  { %251 = vrsqrt.f32 %v78_v20  ;;  %vm88_vm4 = vcmp.eq.f32.partialorder %v78_v20, inf  ;;  %v91_v29 = vand.u32 2147483648, %v78_v20  ;;  %vm90_vm5 = vcmp.eq.f32.partialorder %v78_v20, 0.0 }
 0x158   :  { %v250_v21 = vpop.eup %249 }
 0x159   :  { %v80_v22 = vmul.f32 %v250_v21, %v77_v18 }
 0x15b   :  { %v82_v24 = vsel %vm81_vm2, %v77_v18, %v80_v22 }
 0x15c   :  { %v252_v25 = vpop.eup %251  ;;  %v85_v26 = vsel %vm83_vm3, %v84_v23, %v82_v24 }
 0x15d   :  { %v93_v27 = vadd.f32 1e-06, %v85_v26  ;;  %v87_v28 = vmul.f32 %v252_v25, %v78_v20 }
 0x15f   :  { %253 = vrcp.f32 %v93_v27  ;;  %v89_v30 = vsel %vm88_vm4, %v78_v20, %v87_v28 }
 0x160   :  { %v92_v31 = vsel %vm90_vm5, %v91_v29, %v89_v30 }
 0x161   :  { %v94_v32 = vadd.f32 1e-06, %v92_v31 }
 0x163   :  { %255 = vrcp.f32 %v94_v32 }
 0x169   :  { %v254_v33 = vpop.eup %253 }
 0x16a   :  { %v98_v34 = vmul.f32 %v254_v33, %v66_v6 }
 0x16c   :  { %v106_v37 = vmul.f32 %v217_v35, %v98_v34 }
 0x16d   :  { %v256_v36 = vpop.eup %255 }
 0x16e   :  { %v99_v38 = vmul.f32 %v256_v36, %v67_v10  ;;  %v115_v41 = vadd.f32 %v218_v39, %v106_v37 }
 0x170   :  { %v107_v40 = vmul.f32 %v217_v35, %v99_v38 }
 0x172   :  { %v116_v42 = vadd.f32 %v218_v39, %v107_v40 }
 0x174   :  { %v117_v43 = vpack.c.bf16 %v116_v42, %v115_v41 }
 0x176   :  { %118 = vst.msk [vmem:[#allocation2] sm:$0xff] %vm56_vm0, %v117_v43 }
 0x17d   :  { %v119_v44 = vld [vmem:[#allocation2] sm:$0xff] }
 0x17e   :  { %235 = vmatmul.mubr.msk.bf16.vlgmr.msra.gmra.mrb[0].mxu0 %vm56_vm0, %v119_v44 }
 0x251   :  { %v181_v46 = vpop.f32.mrb[0].mxu0 }
 0x252   :  { %v182_v47 = vadd.f32 %v219_v45, %v181_v46  ;;  %v236_v48 = vpop.f32.mrb[1].mxu0 }
 0x253   :  { %v184_v49 = vpop.f32.mrb[2].mxu0 }
 0x254   :  { %v225_v50 = vpack.c.bf16 %v182_v47, %v182_v47  ;;  %v185_v51 = vadd.f32 %v219_v45, %v184_v49  ;;  %v237_v52 = vpop.f32.mrb[3].mxu0 }
 0x256   :  { %v226_v53 = vpack.c.bf16 %v185_v51, %v185_v51  ;;  %197 = vst.msk [vmem:[#allocation8] sm:$0xf] %vm196_vm6, %v225_v50 }
 0x258   :  { %198 = vst.msk [vmem:[#allocation8 + $0x4] sm:$0xf] %vm196_vm6, %v226_v53 }
 0x259   :  { %312 = shalt.err (!%p309_p6)
}
 0x25a   :  { %s313_s27 = scalar_lea.hbm %s430_s5, 128 }
 0x25b   :  { %p314_p7 = scmp.ne.s32.totalorder %s430_s5, %s313_s27  ;;  %p317_p8 = scmp.lt.u32.totalorder %s313_s27, %s430_s5 }
 0x25d   :  { %p319_p9 = pnand %p317_p8, %p314_p7 }
 0x25f   :  { %322 = shalt.err (!%p319_p9)
}
 0x260   :  { %210 = dma.vmem_to_hbm [thread:$0]  %s205_s2, 128, %s430_s5, [#allocation5], %s333_s0, %s333_s0, %s334_s17  }
 0x261   :  { %327 = dma.done.wait [#allocation5], 128  }
 0x262   :  { %328 = vsyncadd [#allocation5], 4294967168 }
 0x263   :  { %214 = vsyncpa [#allocation4], 1 }
 0x264   :  { %215 = vsyncpa [#allocation7], 1 }
 0x265   :  { %216 = vsyncpa [#allocation5], 1 }

</bundles_post_ra>
